<compile_context>
chip_gen: v7x
topology: tpu7x:2x2x1
jax: 0.10.0
libtpu: 0.0.40
codegen_flags: <defaults>
</compile_context>

<pallas_src>
import math
import functools

import jax
import jax.numpy as jnp
from jax import lax
from jax.experimental import pallas as pl
from jax.experimental.pallas import tpu as pltpu


def _teacher_sr_kernel(x_ref, adj_ref, w1_ref, b1_ref, w2_ref, b2_ref,
                       w3_ref, b3_ref, o_ref, *, timepoints):
    """Fused forward: relu(adj @ (h @ W) + b) for gc1, gc2, then gc3 x (T-1)."""
    adj_bf = adj_ref[...]                       # bf16, VMEM resident
    n = adj_bf.shape[0]
    nout = w2_ref.shape[1]

    def gcn_relu(h_bf, w_bf, b_f32):
        # support = h @ W          (MXU, bf16 in / f32 acc)
        support = jnp.dot(h_bf, w_bf, preferred_element_type=jnp.float32)
        # output  = adj @ support  (MXU, bf16 in / f32 acc)
        out = jnp.dot(adj_bf, support.astype(jnp.bfloat16),
                      preferred_element_type=jnp.float32)
        # bias add + ReLU          (VPU, f32)
        return jnp.maximum(out + b_f32, 0.0)

    # gc1, gc2
    h = gcn_relu(x_ref[...], w1_ref[...], b1_ref[...])
    h = gcn_relu(h.astype(jnp.bfloat16), w2_ref[...], b2_ref[...])
    o_ref[0] = h                                # lane offset 0: dense store

    # gc3 applied (timepoints - 1) times; W3 / bias broadcast hoisted so the
    # loop body only does the two matmuls + VPU epilogue + one dense store.
    w3_bf = w3_ref[...]
    b3_b = jnp.broadcast_to(b3_ref[...], (n, nout))

    def step(t, h_carry):
        h_new = gcn_relu(h_carry.astype(jnp.bfloat16), w3_bf, b3_b)
        o_ref[t] = h_new
        return h_new

    if timepoints > 1:
        if timepoints <= 8:
            # Short recurrence: full static unroll (LLO sees everything).
            for t in range(1, timepoints):
                h = step(t, h)
        else:
            # Long recurrence: bound code size / live ranges.
            lax.fori_loop(1, timepoints, step, h, unroll=4)


def _full_spec(shape):
    # Block == full array: (8,128) tiling constraint trivially satisfied,
    # no grid iteration, operand stays VMEM-resident.
    nd = len(shape)
    return pl.BlockSpec(shape, lambda *_: (0,) * nd)


def _vmem_limit_bytes(needed_bytes):
    """Generation-aware scoped-VMEM limit.

    The scoped default is only 16 MiB (v5e) / 32 MiB (v6e, v7x); raise it to
    what the fully-resident kernel needs, leaving headroom below physical
    VMEM (128 MiB on v5e/v6e, 64 MiB per TC on v7x).
    """
    phys = 64 << 20  # conservative fallback (v7x per-core VMEM)
    try:
        info = pltpu.get_tpu_info()
        phys = int(getattr(info, "vmem_capacity_bytes", phys) or phys)
    except Exception:
        pass
    cap = min(phys - (8 << 20), 100 << 20)
    return int(min(max(needed_bytes, 32 << 20), cap))


def teacher_sr_fused(x, adj, params, timepoints):
    """One pallas_call computing all timepoint predictions.

    Returns a lane-dense slab of shape (timepoints, N, noutSR), f32.
    """
    (w1, b1), (w2, b2), (w3, b3) = params
    n, nhid1 = x.shape
    nhid2 = w1.shape[1]
    nout = w2.shape[1]

    # bf16 MXU operands (halves adj's HBM DMA + VMEM residency). Biases stay
    # f32: they are added to the f32 accumulator on the VPU.
    x_bf = x.astype(jnp.bfloat16)
    adj_bf = adj.astype(jnp.bfloat16)
    w1_bf, w2_bf, w3_bf = (w.astype(jnp.bfloat16) for w in (w1, w2, w3))

    # Advisory cost hint for XLA scheduling around the custom call.
    flops = (2 * (n * nhid1 * nhid2 + n * n * nhid2)
             + 2 * (n * nhid2 * nout + n * n * nout)
             + (timepoints - 1) * 2 * (n * nout * nout + n * n * nout))
    bytes_accessed = (2 * (x.size + adj.size + w1.size + w2.size + w3.size)
                      + 4 * (b1.size + b2.size + b3.size)
                      + 4 * timepoints * n * nout)
    cost = pl.CostEstimate(flops=flops, transcendentals=0,
                           bytes_accessed=bytes_accessed)

    # Resident footprint estimate: bf16 inputs + f32 biases + f32 output slab,
    # x2 for double-buffered in/out buffers, plus f32 intermediates
    # (support / out / h / h_bf16 / bias broadcast) and slack.
    maxf = max(nhid1, nhid2, nout)
    resident = (2 * (adj.size + x.size + w1.size + w2.size + w3.size)
                + 4 * (b1.size + b2.size + b3.size)
                + 4 * timepoints * n * nout)
    needed = 2 * resident + 12 * 4 * n * maxf + (4 << 20)

    kernel = functools.partial(_teacher_sr_kernel, timepoints=timepoints)

    return pl.pallas_call(
        kernel,
        out_shape=jax.ShapeDtypeStruct((timepoints, n, nout), jnp.float32),
        in_specs=[
            _full_spec(x_bf.shape),
            _full_spec(adj_bf.shape),
            _full_spec(w1_bf.shape), _full_spec(b1.shape),
            _full_spec(w2_bf.shape), _full_spec(b2.shape),
            _full_spec(w3_bf.shape), _full_spec(b3.shape),
        ],
        out_specs=_full_spec((timepoints, n, nout)),
        cost_estimate=cost,
        compiler_params=pltpu.CompilerParams(
            dimension_semantics=(),
            vmem_limit_bytes=_vmem_limit_bytes(needed),
        ),
    )(x_bf, adj_bf, w1_bf, b1, w2_bf, b2, w3_bf, b3)


def init_gcn_params(key, in_features, out_features):
    """Deterministic init matching GCN.reset_parameters: U(-stdv, stdv)."""
    stdv = 1.0 / math.sqrt(out_features)
    kw, kb = jax.random.split(key)
    w = jax.random.uniform(kw, (in_features, out_features), jnp.float32,
                           minval=-stdv, maxval=stdv)
    b = jax.random.uniform(kb, (1, out_features), jnp.float32,
                           minval=-stdv, maxval=stdv)
    return w, b


@functools.partial(jax.jit, static_argnames=("timepoints",))
def teacher_sr_forward(x, adj, params, timepoints):
    """Replicates Teacher_SR.forward (inference mode, dropout = identity).

    Returns a list of `timepoints` arrays of shape (N, noutSR).
    """
    slab = teacher_sr_fused(x, adj, params, timepoints)   # (T, N, nout)
    return [slab[t] for t in range(timepoints)]


def reference_forward(x, adj, params, timepoints):
    (w1, b1), (w2, b2), (w3, b3) = params
    relu = lambda v: jnp.maximum(v, 0.0)
    preds = []
    h = relu(adj @ (x @ w1) + b1)
    h = relu(adj @ (h @ w2) + b2)
    preds.append(h)
    for _ in range(1, timepoints):
        h = relu(adj @ (h @ w3) + b3)
        preds.append(h)
    return preds


if __name__ == "__main__":
    # Small, module-consistent shapes.
    N = 16          # number of graph nodes (ROIs)
    nhid1 = 32
    nhid2 = 32
    noutSR = 32
    timepoints = 3

    key = jax.random.PRNGKey(0)
    kx, kadj, k1, k2, k3 = jax.random.split(key, 5)

    x = jax.random.normal(kx, (N, nhid1), jnp.float32)
    # Symmetric, row-normalized dense adjacency.
    a = jax.random.uniform(kadj, (N, N), jnp.float32)
    adj = (a + a.T) * 0.5
    adj = adj / jnp.sum(adj, axis=1, keepdims=True)

    params = (
        init_gcn_params(k1, nhid1, nhid2),
        init_gcn_params(k2, nhid2, noutSR),
        init_gcn_params(k3, noutSR, noutSR),
    )

    preds = teacher_sr_forward(x, adj, params, timepoints)
    preds = [jax.block_until_ready(p) for p in preds]

    # f32 reference; kernel uses bf16 MXU operands with f32 accumulation, so
    # tolerance is relaxed accordingly (~bf16 precision across 4 GCN layers).
    refs = reference_forward(x, adj, params, timepoints)
    assert len(preds) == timepoints
    for p, r in zip(preds, refs):
        assert p.shape == r.shape, f"shape mismatch {p.shape} vs {r.shape}"
        assert jnp.allclose(p, r, atol=5e-2, rtol=5e-2), "mismatch vs reference"

    print("KERNEL_OK")
</pallas_src>

<mosaic_0001>
module attributes {stable_mosaic.version = 11 : i64} {
  func.func @_teacher_sr_kernel(%arg0: memref<16x32xbf16, #tpu.memory_space<vmem>>, %arg1: memref<16x16xbf16, #tpu.memory_space<vmem>>, %arg2: memref<32x32xbf16, #tpu.memory_space<vmem>>, %arg3: memref<1x32xf32, #tpu.memory_space<vmem>>, %arg4: memref<32x32xbf16, #tpu.memory_space<vmem>>, %arg5: memref<1x32xf32, #tpu.memory_space<vmem>>, %arg6: memref<32x32xbf16, #tpu.memory_space<vmem>>, %arg7: memref<1x32xf32, #tpu.memory_space<vmem>>, %arg8: memref<3x16x32xf32, #tpu.memory_space<vmem>>) attributes {dimension_semantics = [], scalar_prefetch = 0 : i64, scratch_operands = 0 : i64, tpu.core_type = #tpu.core_type<tc>} {
    %c0 = arith.constant 0 : index
    %c0_0 = arith.constant 0 : index
    %0 = vector.load %arg1[%c0, %c0_0] : memref<16x16xbf16, #tpu.memory_space<vmem>>, vector<16x16xbf16>
    %c0_1 = arith.constant 0 : index
    %c0_2 = arith.constant 0 : index
    %1 = vector.load %arg0[%c0_1, %c0_2] : memref<16x32xbf16, #tpu.memory_space<vmem>>, vector<16x32xbf16>
    %c0_3 = arith.constant 0 : index
    %c0_4 = arith.constant 0 : index
    %2 = vector.load %arg2[%c0_3, %c0_4] : memref<32x32xbf16, #tpu.memory_space<vmem>>, vector<32x32xbf16>
    %c0_5 = arith.constant 0 : index
    %c0_6 = arith.constant 0 : index
    %3 = vector.load %arg3[%c0_5, %c0_6] : memref<1x32xf32, #tpu.memory_space<vmem>>, vector<1x32xf32>
    %cst = arith.constant dense<0.000000e+00> : vector<16x32xf32>
    %4 = tpu.matmul %1, %2, %cst {dimension_numbers = #tpu.dot_dimension_numbers<[1], [0], [0], [1], [0, 0, 1, 1], [], []>} : vector<16x32xbf16>, vector<32x32xbf16>, vector<16x32xf32> -> vector<16x32xf32>
    %5 = arith.truncf %4 : vector<16x32xf32> to vector<16x32xbf16>
    %cst_7 = arith.constant dense<0.000000e+00> : vector<16x32xf32>
    %6 = tpu.matmul %0, %5, %cst_7 {dimension_numbers = #tpu.dot_dimension_numbers<[1], [0], [0], [1], [0, 0, 1, 1], [], []>} : vector<16x16xbf16>, vector<16x32xbf16>, vector<16x32xf32> -> vector<16x32xf32>
    %7 = vector.broadcast %3 : vector<1x32xf32> to vector<16x32xf32>
    %8 = arith.addf %6, %7 : vector<16x32xf32>
    %cst_8 = arith.constant 0.000000e+00 : f32
    %9 = vector.broadcast %cst_8 : f32 to vector<16x32xf32>
    %10 = arith.maximumf %8, %9 : vector<16x32xf32>
    %11 = arith.truncf %10 : vector<16x32xf32> to vector<16x32xbf16>
    %c0_9 = arith.constant 0 : index
    %c0_10 = arith.constant 0 : index
    %12 = vector.load %arg4[%c0_9, %c0_10] : memref<32x32xbf16, #tpu.memory_space<vmem>>, vector<32x32xbf16>
    %c0_11 = arith.constant 0 : index
    %c0_12 = arith.constant 0 : index
    %13 = vector.load %arg5[%c0_11, %c0_12] : memref<1x32xf32, #tpu.memory_space<vmem>>, vector<1x32xf32>
    %cst_13 = arith.constant dense<0.000000e+00> : vector<16x32xf32>
    %14 = tpu.matmul %11, %12, %cst_13 {dimension_numbers = #tpu.dot_dimension_numbers<[1], [0], [0], [1], [0, 0, 1, 1], [], []>} : vector<16x32xbf16>, vector<32x32xbf16>, vector<16x32xf32> -> vector<16x32xf32>
    %15 = arith.truncf %14 : vector<16x32xf32> to vector<16x32xbf16>
    %cst_14 = arith.constant dense<0.000000e+00> : vector<16x32xf32>
    %16 = tpu.matmul %0, %15, %cst_14 {dimension_numbers = #tpu.dot_dimension_numbers<[1], [0], [0], [1], [0, 0, 1, 1], [], []>} : vector<16x16xbf16>, vector<16x32xbf16>, vector<16x32xf32> -> vector<16x32xf32>
    %17 = vector.broadcast %13 : vector<1x32xf32> to vector<16x32xf32>
    %18 = arith.addf %16, %17 : vector<16x32xf32>
    %cst_15 = arith.constant 0.000000e+00 : f32
    %19 = vector.broadcast %cst_15 : f32 to vector<16x32xf32>
    %20 = arith.maximumf %18, %19 : vector<16x32xf32>
    %c0_16 = arith.constant 0 : index
    %c0_17 = arith.constant 0 : index
    %c0_18 = arith.constant 0 : index
    %21 = vector.load %arg8[%c0_16, %c0_17, %c0_18] : memref<3x16x32xf32, #tpu.memory_space<vmem>>, vector<1x16x32xf32>
    %22 = vector.shape_cast %21 : vector<1x16x32xf32> to vector<16x32xf32>
    %23 = vector.shape_cast %20 : vector<16x32xf32> to vector<1x16x32xf32>
    tpu.vector_store %arg8[%c0_16, %c0_17, %c0_18], %23 {strides = array<i32>} : memref<3x16x32xf32, #tpu.memory_space<vmem>>, vector<1x16x32xf32>,
    %c0_19 = arith.constant 0 : index
    %c0_20 = arith.constant 0 : index
    %24 = vector.load %arg6[%c0_19, %c0_20] : memref<32x32xbf16, #tpu.memory_space<vmem>>, vector<32x32xbf16>
    %c0_21 = arith.constant 0 : index
    %c0_22 = arith.constant 0 : index
    %25 = vector.load %arg7[%c0_21, %c0_22] : memref<1x32xf32, #tpu.memory_space<vmem>>, vector<1x32xf32>
    %26 = vector.shape_cast %25 : vector<1x32xf32> to vector<1x32xf32>
    %27 = vector.broadcast %26 : vector<1x32xf32> to vector<16x32xf32>
    %28 = arith.truncf %20 : vector<16x32xf32> to vector<16x32xbf16>
    %cst_23 = arith.constant dense<0.000000e+00> : vector<16x32xf32>
    %29 = tpu.matmul %28, %24, %cst_23 {dimension_numbers = #tpu.dot_dimension_numbers<[1], [0], [0], [1], [0, 0, 1, 1], [], []>} : vector<16x32xbf16>, vector<32x32xbf16>, vector<16x32xf32> -> vector<16x32xf32>
    %30 = arith.truncf %29 : vector<16x32xf32> to vector<16x32xbf16>
    %cst_24 = arith.constant dense<0.000000e+00> : vector<16x32xf32>
    %31 = tpu.matmul %0, %30, %cst_24 {dimension_numbers = #tpu.dot_dimension_numbers<[1], [0], [0], [1], [0, 0, 1, 1], [], []>} : vector<16x16xbf16>, vector<16x32xbf16>, vector<16x32xf32> -> vector<16x32xf32>
    %32 = arith.addf %31, %27 : vector<16x32xf32>
    %cst_25 = arith.constant 0.000000e+00 : f32
    %33 = vector.broadcast %cst_25 : f32 to vector<16x32xf32>
    %34 = arith.maximumf %32, %33 : vector<16x32xf32>
    %c1 = arith.constant 1 : index
    %c0_26 = arith.constant 0 : index
    %c0_27 = arith.constant 0 : index
    %35 = vector.load %arg8[%c1, %c0_26, %c0_27] : memref<3x16x32xf32, #tpu.memory_space<vmem>>, vector<1x16x32xf32>
    %36 = vector.shape_cast %35 : vector<1x16x32xf32> to vector<16x32xf32>
    %37 = vector.shape_cast %34 : vector<16x32xf32> to vector<1x16x32xf32>
    tpu.vector_store %arg8[%c1, %c0_26, %c0_27], %37 {strides = array<i32>} : memref<3x16x32xf32, #tpu.memory_space<vmem>>, vector<1x16x32xf32>,
    %38 = arith.truncf %34 : vector<16x32xf32> to vector<16x32xbf16>
    %cst_28 = arith.constant dense<0.000000e+00> : vector<16x32xf32>
    %39 = tpu.matmul %38, %24, %cst_28 {dimension_numbers = #tpu.dot_dimension_numbers<[1], [0], [0], [1], [0, 0, 1, 1], [], []>} : vector<16x32xbf16>, vector<32x32xbf16>, vector<16x32xf32> -> vector<16x32xf32>
    %40 = arith.truncf %39 : vector<16x32xf32> to vector<16x32xbf16>
    %cst_29 = arith.constant dense<0.000000e+00> : vector<16x32xf32>
    %41 = tpu.matmul %0, %40, %cst_29 {dimension_numbers = #tpu.dot_dimension_numbers<[1], [0], [0], [1], [0, 0, 1, 1], [], []>} : vector<16x16xbf16>, vector<16x32xbf16>, vector<16x32xf32> -> vector<16x32xf32>
    %42 = arith.addf %41, %27 : vector<16x32xf32>
    %cst_30 = arith.constant 0.000000e+00 : f32
    %43 = vector.broadcast %cst_30 : f32 to vector<16x32xf32>
    %44 = arith.maximumf %42, %43 : vector<16x32xf32>
    %c2 = arith.constant 2 : index
    %c0_31 = arith.constant 0 : index
    %c0_32 = arith.constant 0 : index
    %45 = vector.load %arg8[%c2, %c0_31, %c0_32] : memref<3x16x32xf32, #tpu.memory_space<vmem>>, vector<1x16x32xf32>
    %46 = vector.shape_cast %45 : vector<1x16x32xf32> to vector<16x32xf32>
    %47 = vector.shape_cast %44 : vector<16x32xf32> to vector<1x16x32xf32>
    tpu.vector_store %arg8[%c2, %c0_31, %c0_32], %47 {strides = array<i32>} : memref<3x16x32xf32, #tpu.memory_space<vmem>>, vector<1x16x32xf32>,
    return
  }
}

</mosaic_0001>

<bundles_post_ra>
// kernel: teacher_sr_forward.1
= control target key start
LH: loop header
LB: loop body
LE: loop exit
PB: predicated region body
PF: predicated region fallthrough
CT: control target
= control target key end

     0   :  { %v594_v0 = vmov 0.0   ;;  %vm595_vm0 = vmmov 0   ;;  %vm56_vm1 = vcmask 261120   ;;  %vm113_vm2 = vcmask 130048   ;;  %s740_s2 = inlined_call_operand.vmem [shape: bf16[32,32], index: 2, kind: input, shape index: {}]   ;;  %s741_s0 = inlined_call_operand.vmem [shape: bf16[16,32], index: 0, kind: input, shape index: {}]   ;;  %s742_s1 = inlined_call_operand.vmem [shape: bf16[16,16], index: 1, kind: input, shape index: {}]   ;;  %s743_s4 = inlined_call_operand.vmem [shape: bf16[32,32], index: 4, kind: input, shape index: {}]   ;;  %s744_s3 = inlined_call_operand.vmem [shape: f32[1,32], index: 3, kind: input, shape index: {}]   ;;  %s745_s6 = inlined_call_operand.vmem [shape: bf16[32,32], index: 6, kind: input, shape index: {}]   ;;  %s746_s5 = inlined_call_operand.vmem [shape: f32[1,32], index: 5, kind: input, shape index: {}]   ;;  %s747_s8 = inlined_call_operand.vmem [shape: f32[3,16,32], index: 8, kind: output, shape index: {}]   ;;  %s748_s7 = inlined_call_operand.vmem [shape: f32[1,32], index: 7, kind: input, shape index: {}]  }
   0x1   :  { %528 = vmatprep.subr.bf16.mxu0 %v594_v0  ;;  %v586_v1 = vld [vmem:[%s740_s2] sm:$0xff]   ;;  %532 = vmatprep.mubr.msk.bf16.mxu0 %vm595_vm0, %v594_v0  ;;  %v587_v2 = vld [vmem:[%s740_s2 + $0x8] sm:$0xff]  }
   0x2   :  { %536 = vmatprep.subr.bf16.mxu1 %v594_v0  ;;  %538 = vmatprep.mubr.msk.bf16.mxu1 %vm595_vm0, %v594_v0  ;;  %v588_v3 = vld [vmem:[%s741_s0] sm:$0xff]   ;;  %v591_v11 = vld [vmem:[%s743_s4 + $0x8] sm:$0xff]  }
   0x3   :  { %529 = vmatpush3.bf16.msra.mxu0 %v586_v1  ;;  %v664_v9 = vld [vmem:[%s742_s1] sm:$0xff]   ;;  %v593_v28 = vld [vmem:[%s745_s6 + $0x8] sm:$0xff]  }
   0x4   :  { %530 = vmatprep.subr.bf16.mxu0 %v594_v0  ;;  %v590_v10 = vld [vmem:[%s743_s4] sm:$0xff]  }
   0x5   :  { %v489_v12 = vld [vmem:[%s744_s3] ss:$0 sm:$0xff] }
   0x6   :  { %v592_v27 = vld [vmem:[%s745_s6] sm:$0xff]  }
   0x7   :  { %531 = vmatpush3.bf16.msra.mxu0 %v587_v2  ;;  %v495_v29 = vld [vmem:[%s746_s5] ss:$0 sm:$0xff] }
   0x8   :  { %550 = vmatprep.subr.bf16.mxu0 %v594_v0  ;;  %v497_v44 = vld [vmem:[%s748_s7] ss:$0 sm:$0xff] }
   0xa   :  { %533 = vmatmul.mubr.msk.bf16.vlgmr.msra.gmra.mrb[0].mxu0 %vm56_vm1, %v588_v3 }
   0xb   :  { %552 = vmatprep.mubr.msk.bf16.mxu0 %vm595_vm0, %v594_v0 }
  0xdd   :  { %v94_v4 = vpop.f32.mrb[0].mxu0 }
  0xde   :  { %v534_v5 = vpop.f32.mrb[1].mxu0 }
  0xdf   :  { %v97_v6 = vpop.f32.mrb[2].mxu0 }
  0xe0   :  { %v101_v7 = vpack.c.bf16 %v97_v6, %v94_v4  ;;  %v535_v8 = vpop.f32.mrb[3].mxu0 }
  0xe2   :  { %537 = vmatpush3.bf16.msra.mxu1 %v101_v7 }
  0xe3   :  { %542 = vmatprep.subr.bf16.mxu1 %v594_v0 }
  0xe5   :  { %539 = vmatmul.mubr.msk.bf16.vlgmr.msra.gmra.mrb[0].mxu1 %vm113_vm2, %v664_v9 }
  0xe6   :  { %546 = vmatprep.mubr.msk.bf16.mxu1 %vm595_vm0, %v594_v0  ;;  %543 = vmatpush3.bf16.msra.mxu1 %v590_v10 }
  0xe7   :  { %544 = vmatprep.subr.bf16.mxu1 %v594_v0 }
  0xea   :  { %545 = vmatpush3.bf16.msra.mxu1 %v591_v11 }
  0xeb   :  { %556 = vmatprep.subr.bf16.mxu1 %v594_v0 }
 0x1b8   :  { %v151_v13 = vpop.f32.mrb[0].mxu1 }
 0x1b9   :  { %v152_v14 = vadd.f32 %v489_v12, %v151_v13  ;;  %v540_v15 = vpop.f32.mrb[1].mxu1 }
 0x1ba   :  { %v154_v16 = vpop.f32.mrb[2].mxu1 }
 0x1bb   :  { %v155_v17 = vadd.f32 %v489_v12, %v154_v16  ;;  %v541_v18 = vpop.f32.mrb[3].mxu1  ;;  %v158_v19 = vmax.f32 %v152_v14, 0.0 }
 0x1bd   :  { %v159_v20 = vmax.f32 %v155_v17, 0.0 }
 0x1bf   :  { %v160_v21 = vpack.c.bf16 %v159_v20, %v158_v19 }
 0x1c1   :  { %547 = vmatmul.mubr.msk.bf16.vlgmr.msra.gmra.mrb[4].mxu1 %vm56_vm1, %v160_v21 }
 0x1c2   :  { %560 = vmatprep.mubr.msk.bf16.mxu1 %vm595_vm0, %v594_v0  ;;  %557 = vmatpush3.bf16.msra.mxu1 %v592_v27 }
 0x1c3   :  { %558 = vmatprep.subr.bf16.mxu1 %v594_v0 }
 0x1c6   :  { %559 = vmatpush3.bf16.msra.mxu1 %v593_v28 }
 0x1c7   :  { %570 = vmatprep.subr.bf16.mxu1 %v594_v0 }
 0x294   :  { %v215_v22 = vpop.f32.mrb[4].mxu1 }
 0x295   :  { %v548_v23 = vpop.f32.mrb[5].mxu1 }
 0x296   :  { %v218_v24 = vpop.f32.mrb[6].mxu1 }
 0x297   :  { %v222_v25 = vpack.c.bf16 %v218_v24, %v215_v22  ;;  %v549_v26 = vpop.f32.mrb[7].mxu1 }
 0x299   :  { %551 = vmatpush3.bf16.msra.mxu0 %v222_v25 }
 0x29a   :  { %564 = vmatprep.subr.bf16.mxu0 %v594_v0 }
 0x29c   :  { %553 = vmatmul.mubr.msk.bf16.vlgmr.msra.gmra.mrb[4].mxu0 %vm113_vm2, %v664_v9 }
 0x29d   :  { %566 = vmatprep.mubr.msk.bf16.mxu0 %vm595_vm0, %v594_v0 }
 0x36f   :  { %v263_v30 = vpop.f32.mrb[4].mxu0 }
 0x370   :  { %v264_v31 = vadd.f32 %v495_v29, %v263_v30  ;;  %v554_v32 = vpop.f32.mrb[5].mxu0 }
 0x371   :  { %v266_v33 = vpop.f32.mrb[6].mxu0 }
 0x372   :  { %v270_v34 = vmax.f32 %v264_v31, 0.0  ;;  %v267_v35 = vadd.f32 %v495_v29, %v266_v33  ;;  %v555_v36 = vpop.f32.mrb[7].mxu0 }
 0x374   :  { %272 = vst.msk [vmem:[%s747_s8] sm:$0xff] %vm56_vm1, %v270_v34  ;;  %v271_v37 = vmax.f32 %v267_v35, 0.0 }
 0x376   :  { %273 = vst.msk [vmem:[%s747_s8 + $0x8] sm:$0xff] %vm56_vm1, %v271_v37  ;;  %v285_v38 = vpack.c.bf16 %v271_v37, %v270_v34 }
 0x378   :  { %561 = vmatmul.mubr.msk.bf16.vlgmr.msra.gmra.mrb[8].mxu1 %vm56_vm1, %v285_v38 }
 0x379   :  { %571 = vmatpush3.bf16.msra.mxu1 %v592_v27  ;;  %574 = vmatprep.mubr.msk.bf16.mxu1 %vm595_vm0, %v594_v0 }
 0x37a   :  { %572 = vmatprep.subr.bf16.mxu1 %v594_v0 }
 0x37d   :  { %573 = vmatpush3.bf16.msra.mxu1 %v593_v28 }
 0x44b   :  { %v335_v39 = vpop.f32.mrb[8].mxu1 }
 0x44c   :  { %v562_v40 = vpop.f32.mrb[9].mxu1 }
 0x44d   :  { %v338_v41 = vpop.f32.mrb[10].mxu1 }
 0x44e   :  { %v342_v42 = vpack.c.bf16 %v338_v41, %v335_v39  ;;  %v563_v43 = vpop.f32.mrb[11].mxu1 }
 0x450   :  { %565 = vmatpush3.bf16.msra.mxu0 %v342_v42 }
 0x451   :  { %578 = vmatprep.subr.bf16.mxu0 %v594_v0 }
 0x453   :  { %567 = vmatmul.mubr.msk.bf16.vlgmr.msra.gmra.mrb[8].mxu0 %vm113_vm2, %v664_v9 }
 0x454   :  { %580 = vmatprep.mubr.msk.bf16.mxu0 %vm595_vm0, %v594_v0 }
 0x526   :  { %v377_v45 = vpop.f32.mrb[8].mxu0 }
 0x527   :  { %v378_v46 = vadd.f32 %v497_v44, %v377_v45  ;;  %v568_v47 = vpop.f32.mrb[9].mxu0 }
 0x528   :  { %v380_v48 = vpop.f32.mrb[10].mxu0 }
 0x529   :  { %v384_v49 = vmax.f32 %v378_v46, 0.0  ;;  %v381_v50 = vadd.f32 %v497_v44, %v380_v48  ;;  %v569_v51 = vpop.f32.mrb[11].mxu0 }
 0x52b   :  { %502 = vst.msk [vmem:[%s747_s8 + $0x10] sm:$0xff] %vm56_vm1, %v384_v49  ;;  %v385_v52 = vmax.f32 %v381_v50, 0.0 }
 0x52d   :  { %503 = vst.msk [vmem:[%s747_s8 + $0x18] sm:$0xff] %vm56_vm1, %v385_v52  ;;  %v389_v53 = vpack.c.bf16 %v385_v52, %v384_v49 }
 0x52f   :  { %575 = vmatmul.mubr.msk.bf16.vlgmr.msra.gmra.mrb[12].mxu1 %vm56_vm1, %v389_v53 }
 0x602   :  { %v427_v54 = vpop.f32.mrb[12].mxu1 }
 0x603   :  { %v576_v55 = vpop.f32.mrb[13].mxu1 }
 0x604   :  { %v430_v56 = vpop.f32.mrb[14].mxu1 }
 0x605   :  { %v434_v57 = vpack.c.bf16 %v430_v56, %v427_v54  ;;  %v577_v58 = vpop.f32.mrb[15].mxu1 }
 0x607   :  { %579 = vmatpush3.bf16.msra.mxu0 %v434_v57 }
 0x60a   :  { %581 = vmatmul.mubr.msk.bf16.vlgmr.msra.gmra.mrb[12].mxu0 %vm113_vm2, %v664_v9 }
 0x6dd   :  { %v469_v59 = vpop.f32.mrb[12].mxu0 }
 0x6de   :  { %v470_v60 = vadd.f32 %v497_v44, %v469_v59  ;;  %v582_v61 = vpop.f32.mrb[13].mxu0 }
 0x6df   :  { %v472_v62 = vpop.f32.mrb[14].mxu0 }
 0x6e0   :  { %v476_v63 = vmax.f32 %v470_v60, 0.0  ;;  %v473_v0 = vadd.f32 %v497_v44, %v472_v62  ;;  %v583_v1 = vpop.f32.mrb[15].mxu0 }
 0x6e2   :  { %506 = vst.msk [vmem:[%s747_s8 + $0x20] sm:$0xff] %vm56_vm1, %v476_v63  ;;  %v477_v2 = vmax.f32 %v473_v0, 0.0 }
 0x6e4   :  { %507 = vst.msk [vmem:[%s747_s8 + $0x28] sm:$0xff] %vm56_vm1, %v477_v2 }

</bundles_post_ra>
